<compile_context>
chip_gen: v7x
topology: tpu7x:2x2x1
jax: 0.10.0
libtpu: 0.0.40
codegen_flags: <defaults>
</compile_context>

<pallas_src>
import jax
import jax.numpy as jnp
from jax.experimental import pallas as pl
from jax.experimental.pallas import tpu as pltpu

_SQRT_2_OVER_PI = 0.7978845608028654


def _gelu_tanh(g):
    # TODO(synk): PyTorch F.gelu default is the exact erf form; the tanh
    # approximation is used here (max deviation ~1e-3) because erf lowering
    # inside Mosaic is not guaranteed.
    return 0.5 * g * (1.0 + jnp.tanh(_SQRT_2_OVER_PI * (g + 0.044715 * g * g * g)))


def geglu_kernel(x_ref, wg_ref, bg_ref, wp_ref, bp_ref, o_ref):
    # x_ref : (TB, D)            activations (batch tile)
    # wg_ref: (L, D, 3D)         fused nBRC weights per GLU layer (bf16 default)
    # bg_ref: (L, 1, 3D)         fused nBRC biases per GLU layer (f32)
    # wp_ref: (D, 2*dim_out)     projection weight (pre-transposed)
    # bp_ref: (1, 2*dim_out)     projection bias (f32)
    # o_ref : (TB, dim_out)      output tile
    D = x_ref.shape[1]
    L = wg_ref.shape[0]
    dim_out = o_ref.shape[1]
    mm_dtype = wg_ref.dtype

    h = x_ref[...].astype(jnp.float32)

    for l in range(L):  # static unroll over GLU / nBRC layers (L is small)
        h_mm = h.astype(mm_dtype)  # bf16 MXU operands; f32 recurrent state kept
        # h == x inside GLU, so Ua/Wa/Uc/Wc/U collapse into one wide operand.
        # Issue the [a|c] columns and the u columns as two MXU passes so the
        # EUP tanh/sigmoid on z_ac overlaps the second matmul.
        z_ac = jnp.dot(h_mm, wg_ref[l, :, :2 * D],
                       preferred_element_type=jnp.float32) + bg_ref[l, :, :2 * D]
        z_u = jnp.dot(h_mm, wg_ref[l, :, 2 * D:],
                      preferred_element_type=jnp.float32) + bg_ref[l, :, 2 * D:]
        a = 1.0 + jnp.tanh(z_ac[:, :D])
        c = jax.nn.sigmoid(z_ac[:, D:])
        t = jnp.tanh(z_u + a * h)
        h = h + (1.0 - c) * (t - h)          # == c*h + (1-c)*t

    # Final Linear(dim_in, 2*dim_out), split, and GEGLU gating (f32 epilogue).
    p = jnp.dot(h.astype(wp_ref.dtype), wp_ref[...],
                preferred_element_type=jnp.float32) + bp_ref[...]
    val = p[:, :dim_out]
    gate = p[:, dim_out:]
    o_ref[...] = (val * _gelu_tanh(gate)).astype(o_ref.dtype)


def _round_up(x, m):
    return ((x + m - 1) // m) * m


def _choose_block_b(B, block_b):
    """Batch tile: multiple of 8 (or == B), >= 2 grid steps when possible (v7x
    megacore), preferring a divisor of B so no host-side pad copy is needed."""
    if B <= 8:
        return B
    target = min(block_b, B)
    # Cap so the grid has at least 2 steps -> both v7x TensorCores get work.
    target = min(target, _round_up(pl.cdiv(B, 2), 8))
    target = max(8, (target // 8) * 8)
    for cand in range(target, 7, -8):   # largest multiple-of-8 divisor of B
        if B % cand == 0:
            return cand
    return target                        # no divisor: fall back to padding


def geglu_forward(x, wg, bg, wp, bp, *, block_b=512, out_dtype=None):
    """x: (B, D). wg: (L, D, 3D). bg: (L, 1, 3D). wp: (D, 2*dim_out). bp: (1, 2*dim_out)."""
    B, D = x.shape
    L, Dw, D3 = wg.shape
    assert Dw == D and D3 == 3 * D, "GLU/nBRC requires dims == hidden_dims"
    two_do = wp.shape[1]
    dim_out = two_do // 2
    assert D % 128 == 0, "dim_in must be a multiple of 128 (TPU lane width)"
    assert dim_out % 128 == 0, "dim_out must be a multiple of 128 (TPU lane width)"
    out_dtype = x.dtype if out_dtype is None else out_dtype

    bb = _choose_block_b(B, block_b)
    pad = (-B) % bb
    if pad:  # fallback only; _choose_block_b prefers divisors of B (no pad copy)
        x = jnp.pad(x, ((0, pad), (0, 0)))
    Bp = B + pad

    isz = lambda a: jnp.dtype(a.dtype).itemsize
    out_isz = jnp.dtype(out_dtype).itemsize
    weight_bytes = wg.size * isz(wg) + wp.size * isz(wp)      # single-buffered
    bias_bytes = bg.size * isz(bg) + bp.size * isz(bp)        # single-buffered
    io_bytes = 2 * bb * D * isz(x) + 2 * bb * dim_out * out_isz   # double-buffered tiles
    vmem_limit = int(1.25 * (weight_bytes + bias_bytes + io_bytes)) + (4 << 20)
    vmem_limit = max(16 << 20, min(vmem_limit, 96 << 20))
    # TODO(synk): if weights alone approach ~40 MiB (large D on v7x's 64 MiB VMEM),
    # switch to an N-tiled grid over the 3D / 2*dim_out column axes instead of
    # assuming whole-weight VMEM residency.

    flops = 2 * Bp * D * (3 * D * L + two_do)
    transcendentals = Bp * (3 * D * L + dim_out)
    bytes_accessed = (Bp * D * isz(x) + Bp * dim_out * out_isz
                      + weight_bytes + bias_bytes)
    cost = pl.CostEstimate(flops=flops, transcendentals=transcendentals,
                           bytes_accessed=bytes_accessed)

    out = pl.pallas_call(
        geglu_kernel,
        out_shape=jax.ShapeDtypeStruct((Bp, dim_out), out_dtype),
        grid_spec=pltpu.PrefetchScalarGridSpec(
            num_scalar_prefetch=0,
            grid=(Bp // bb,),
            in_specs=[
                pl.BlockSpec((bb, D), lambda i: (i, 0)),
                # Constant-indexed + single-buffered: weights/biases DMA'd once,
                # stay VMEM-resident without the 2x double-buffer footprint.
                pl.BlockSpec((L, D, 3 * D), lambda i: (0, 0, 0),
                             pipeline_mode=pl.Buffered(1)),
                pl.BlockSpec((L, 1, 3 * D), lambda i: (0, 0, 0),
                             pipeline_mode=pl.Buffered(1)),
                pl.BlockSpec((D, two_do), lambda i: (0, 0),
                             pipeline_mode=pl.Buffered(1)),
                pl.BlockSpec((1, two_do), lambda i: (0, 0),
                             pipeline_mode=pl.Buffered(1)),
            ],
            out_specs=pl.BlockSpec((bb, dim_out), lambda i: (i, 0)),
        ),
        compiler_params=pltpu.CompilerParams(
            dimension_semantics=("parallel",),
            vmem_limit_bytes=vmem_limit,
        ),
        cost_estimate=cost,
    )(x, wg, bg, wp, bp)
    return out[:B] if pad else out


def fuse_geglu_params(glu_params, proj_w, proj_b, compute_dtype=jnp.bfloat16):
    """glu_params: list (per layer) of 5 (weight[H,D], bias[H]) pairs: Ua, Wa, Uc, Wc, U.

    bf16 matmul operands are the default (fast MXU path on v5e/v6e/v7x); biases
    stay f32 and all accumulation / nonlinearities run in f32 inside the kernel.
    """
    wg_list, bg_list = [], []
    for (ua_w, ua_b), (wa_w, wa_b), (uc_w, uc_b), (wc_w, wc_b), (u_w, u_b) in glu_params:
        # GLU feeds the same tensor as x and h, so Ua(x)+Wa(x) == x @ (Ua.T + Wa.T)
        # + (b_ua + b_wa); pre-sum the weight/bias pairs and pack the a/c/u column
        # blocks into one (D, 3D) matmul operand.
        w_fused = jnp.concatenate([ua_w.T + wa_w.T, uc_w.T + wc_w.T, u_w.T], axis=1)
        b_fused = jnp.concatenate([ua_b + wa_b, uc_b + wc_b, u_b])[None, :]
        wg_list.append(w_fused)
        bg_list.append(b_fused)
    wg = jnp.stack(wg_list).astype(compute_dtype)   # (L, D, 3D)
    bg = jnp.stack(bg_list).astype(jnp.float32)     # (L, 1, 3D)  -- biases stay f32
    wp = proj_w.T.astype(compute_dtype)             # (D, 2*dim_out)
    bp = proj_b[None, :].astype(jnp.float32)        # (1, 2*dim_out)
    return wg, bg, wp, bp


def init_linear(key, fan_in, fan_out):
    """Deterministic init mimicking nn.Linear default (uniform +/- 1/sqrt(fan_in))."""
    kw, kb = jax.random.split(key)
    bound = 1.0 / (fan_in ** 0.5)
    w = jax.random.uniform(kw, (fan_out, fan_in), jnp.float32, -bound, bound)
    b = jax.random.uniform(kb, (fan_out,), jnp.float32, -bound, bound)
    return w, b


def geglu_reference(x, glu_params, proj_w, proj_b):
    """Pure-JAX reference mirroring the PyTorch module op-for-op."""
    def lin(t, w, b):
        return jnp.dot(t, w.T, precision=jax.lax.Precision.HIGHEST) + b

    h = x
    for (ua_w, ua_b), (wa_w, wa_b), (uc_w, uc_b), (wc_w, wc_b), (u_w, u_b) in glu_params:
        a = 1.0 + jnp.tanh(lin(h, ua_w, ua_b) + lin(h, wa_w, wa_b))
        c = jax.nn.sigmoid(lin(h, uc_w, uc_b) + lin(h, wc_w, wc_b))
        h = c * h + (1.0 - c) * jnp.tanh(lin(h, u_w, u_b) + a * h)
    p = lin(h, proj_w, proj_b)
    val, gate = jnp.split(p, 2, axis=-1)
    return val * _gelu_tanh(gate)


if __name__ == "__main__":
    B, DIM_IN, DIM_OUT, LAYERS = 64, 128, 128, 2   # 128 = TPU lane width minimum

    key = jax.random.PRNGKey(0)
    keys = jax.random.split(key, 2 + 5 * LAYERS)
    x = jax.random.normal(keys[0], (B, DIM_IN), jnp.float32)
    proj_w, proj_b = init_linear(keys[1], DIM_IN, 2 * DIM_OUT)

    glu_params = []
    for layer in range(LAYERS):
        base = 2 + 5 * layer
        glu_params.append(tuple(init_linear(keys[base + j], DIM_IN, DIM_IN)
                                for j in range(5)))

    ref = geglu_reference(x, glu_params, proj_w, proj_b)

    # Primary path: bf16 MXU operands (fast on all generations), f32 accumulation
    # + f32 epilogue.  B=64 -> batch tile 32, grid=(2,) so both v7x cores get work.
    wg, bg, wp, bp = fuse_geglu_params(glu_params, proj_w, proj_b)  # bf16 default
    out_bf16 = jax.block_until_ready(geglu_forward(x, wg, bg, wp, bp))
    assert out_bf16.shape == (B, DIM_OUT)
    assert jnp.allclose(out_bf16, ref, atol=1e-1, rtol=1e-2), "bf16 kernel mismatch vs reference"

    # f32-operand path kept for numerical validation of the kernel structure.
    wg32, bg32, wp32, bp32 = fuse_geglu_params(glu_params, proj_w, proj_b, jnp.float32)
    out_f32 = jax.block_until_ready(geglu_forward(x, wg32, bg32, wp32, bp32))
    assert jnp.allclose(out_f32, ref, atol=2e-2, rtol=2e-3), "f32 kernel mismatch vs reference"

    print("KERNEL_OK")
</pallas_src>

<mosaic_0001>
module attributes {stable_mosaic.version = 11 : i64} {
  func.func @geglu_kernel(%arg0: i32, %arg1: memref<32x128xf32, #tpu.memory_space<vmem>>, %arg2: memref<2x128x384xbf16, #tpu.memory_space<vmem>>, %arg3: memref<2x1x384xf32, #tpu.memory_space<vmem>>, %arg4: memref<128x256xbf16, #tpu.memory_space<vmem>>, %arg5: memref<1x256xf32, #tpu.memory_space<vmem>>, %arg6: memref<32x128xf32, #tpu.memory_space<vmem>>) attributes {dimension_semantics = [#tpu.dimension_semantics<parallel>], iteration_bounds = array<i64: 2>, scalar_prefetch = 0 : i64, scratch_operands = 0 : i64, tpu.core_type = #tpu.core_type<tc>, window_params = [{transform_indices = @transform_0, window_bounds = array<i64: 32, 128>}, {pipeline_mode = #tpu.pipeline_mode<synchronous>, transform_indices = @transform_1, window_bounds = array<i64: 2, 128, 384>}, {pipeline_mode = #tpu.pipeline_mode<synchronous>, transform_indices = @transform_2, window_bounds = array<i64: 2, 1, 384>}, {pipeline_mode = #tpu.pipeline_mode<synchronous>, transform_indices = @transform_3, window_bounds = array<i64: 128, 256>}, {pipeline_mode = #tpu.pipeline_mode<synchronous>, transform_indices = @transform_4, window_bounds = array<i64: 1, 256>}, {transform_indices = @transform_5, window_bounds = array<i64: 32, 128>}]} {
    %c0 = arith.constant 0 : index
    %c0_0 = arith.constant 0 : index
    %0 = vector.load %arg1[%c0, %c0_0] : memref<32x128xf32, #tpu.memory_space<vmem>>, vector<32x128xf32>
    %1 = arith.truncf %0 : vector<32x128xf32> to vector<32x128xbf16>
    %c0_1 = arith.constant 0 : index
    %c0_2 = arith.constant 0 : index
    %c0_3 = arith.constant 0 : index
    %2 = vector.load %arg2[%c0_1, %c0_2, %c0_3] : memref<2x128x384xbf16, #tpu.memory_space<vmem>>, vector<1x128x256xbf16>
    %3 = vector.shape_cast %2 : vector<1x128x256xbf16> to vector<128x256xbf16>
    %cst = arith.constant dense<0.000000e+00> : vector<32x256xf32>
    %4 = tpu.matmul %1, %3, %cst {dimension_numbers = #tpu.dot_dimension_numbers<[1], [0], [0], [1], [0, 0, 1, 1], [], []>} : vector<32x128xbf16>, vector<128x256xbf16>, vector<32x256xf32> -> vector<32x256xf32>
    %c0_4 = arith.constant 0 : index
    %c0_5 = arith.constant 0 : index
    %c0_6 = arith.constant 0 : index
    %5 = vector.load %arg3[%c0_4, %c0_5, %c0_6] : memref<2x1x384xf32, #tpu.memory_space<vmem>>, vector<1x1x256xf32>
    %6 = vector.shape_cast %5 : vector<1x1x256xf32> to vector<1x256xf32>
    %7 = vector.broadcast %6 : vector<1x256xf32> to vector<32x256xf32>
    %8 = arith.addf %4, %7 : vector<32x256xf32>
    %c0_7 = arith.constant 0 : index
    %c0_8 = arith.constant 0 : index
    %c256 = arith.constant 256 : index
    %9 = vector.load %arg2[%c0_7, %c0_8, %c256] : memref<2x128x384xbf16, #tpu.memory_space<vmem>>, vector<1x128x128xbf16>
    %10 = vector.shape_cast %9 : vector<1x128x128xbf16> to vector<128x128xbf16>
    %cst_9 = arith.constant dense<0.000000e+00> : vector<32x128xf32>
    %11 = tpu.matmul %1, %10, %cst_9 {dimension_numbers = #tpu.dot_dimension_numbers<[1], [0], [0], [1], [0, 0, 1, 1], [], []>} : vector<32x128xbf16>, vector<128x128xbf16>, vector<32x128xf32> -> vector<32x128xf32>
    %c0_10 = arith.constant 0 : index
    %c0_11 = arith.constant 0 : index
    %c256_12 = arith.constant 256 : index
    %12 = vector.load %arg3[%c0_10, %c0_11, %c256_12] : memref<2x1x384xf32, #tpu.memory_space<vmem>>, vector<1x1x128xf32>
    %13 = vector.shape_cast %12 : vector<1x1x128xf32> to vector<1x128xf32>
    %14 = vector.broadcast %13 : vector<1x128xf32> to vector<32x128xf32>
    %15 = arith.addf %11, %14 : vector<32x128xf32>
    %16 = vector.extract_strided_slice %8 {offsets = [0, 0], sizes = [32, 128], strides = [1, 1]} : vector<32x256xf32> to vector<32x128xf32>
    %17 = math.tanh %16 : vector<32x128xf32>
    %cst_13 = arith.constant 1.000000e+00 : f32
    %18 = vector.broadcast %cst_13 : f32 to vector<32x128xf32>
    %19 = arith.addf %18, %17 : vector<32x128xf32>
    %20 = vector.extract_strided_slice %8 {offsets = [0, 128], sizes = [32, 128], strides = [1, 1]} : vector<32x256xf32> to vector<32x128xf32>
    %21 = arith.negf %20 : vector<32x128xf32>
    %22 = math.exp %21 : vector<32x128xf32>
    %cst_14 = arith.constant 1.000000e+00 : f32
    %23 = vector.broadcast %cst_14 : f32 to vector<32x128xf32>
    %24 = arith.addf %23, %22 : vector<32x128xf32>
    %25 = arith.divf %23, %24 : vector<32x128xf32>
    %26 = arith.mulf %19, %0 : vector<32x128xf32>
    %27 = arith.addf %15, %26 : vector<32x128xf32>
    %28 = math.tanh %27 : vector<32x128xf32>
    %cst_15 = arith.constant 1.000000e+00 : f32
    %29 = vector.broadcast %cst_15 : f32 to vector<32x128xf32>
    %30 = arith.subf %29, %25 : vector<32x128xf32>
    %31 = arith.subf %28, %0 : vector<32x128xf32>
    %32 = arith.mulf %30, %31 : vector<32x128xf32>
    %33 = arith.addf %0, %32 : vector<32x128xf32>
    %34 = arith.truncf %33 : vector<32x128xf32> to vector<32x128xbf16>
    %c1 = arith.constant 1 : index
    %c0_16 = arith.constant 0 : index
    %c0_17 = arith.constant 0 : index
    %35 = vector.load %arg2[%c1, %c0_16, %c0_17] : memref<2x128x384xbf16, #tpu.memory_space<vmem>>, vector<1x128x256xbf16>
    %36 = vector.shape_cast %35 : vector<1x128x256xbf16> to vector<128x256xbf16>
    %cst_18 = arith.constant dense<0.000000e+00> : vector<32x256xf32>
    %37 = tpu.matmul %34, %36, %cst_18 {dimension_numbers = #tpu.dot_dimension_numbers<[1], [0], [0], [1], [0, 0, 1, 1], [], []>} : vector<32x128xbf16>, vector<128x256xbf16>, vector<32x256xf32> -> vector<32x256xf32>
    %c1_19 = arith.constant 1 : index
    %c0_20 = arith.constant 0 : index
    %c0_21 = arith.constant 0 : index
    %38 = vector.load %arg3[%c1_19, %c0_20, %c0_21] : memref<2x1x384xf32, #tpu.memory_space<vmem>>, vector<1x1x256xf32>
    %39 = vector.shape_cast %38 : vector<1x1x256xf32> to vector<1x256xf32>
    %40 = vector.broadcast %39 : vector<1x256xf32> to vector<32x256xf32>
    %41 = arith.addf %37, %40 : vector<32x256xf32>
    %c1_22 = arith.constant 1 : index
    %c0_23 = arith.constant 0 : index
    %c256_24 = arith.constant 256 : index
    %42 = vector.load %arg2[%c1_22, %c0_23, %c256_24] : memref<2x128x384xbf16, #tpu.memory_space<vmem>>, vector<1x128x128xbf16>
    %43 = vector.shape_cast %42 : vector<1x128x128xbf16> to vector<128x128xbf16>
    %cst_25 = arith.constant dense<0.000000e+00> : vector<32x128xf32>
    %44 = tpu.matmul %34, %43, %cst_25 {dimension_numbers = #tpu.dot_dimension_numbers<[1], [0], [0], [1], [0, 0, 1, 1], [], []>} : vector<32x128xbf16>, vector<128x128xbf16>, vector<32x128xf32> -> vector<32x128xf32>
    %c1_26 = arith.constant 1 : index
    %c0_27 = arith.constant 0 : index
    %c256_28 = arith.constant 256 : index
    %45 = vector.load %arg3[%c1_26, %c0_27, %c256_28] : memref<2x1x384xf32, #tpu.memory_space<vmem>>, vector<1x1x128xf32>
    %46 = vector.shape_cast %45 : vector<1x1x128xf32> to vector<1x128xf32>
    %47 = vector.broadcast %46 : vector<1x128xf32> to vector<32x128xf32>
    %48 = arith.addf %44, %47 : vector<32x128xf32>
    %49 = vector.extract_strided_slice %41 {offsets = [0, 0], sizes = [32, 128], strides = [1, 1]} : vector<32x256xf32> to vector<32x128xf32>
    %50 = math.tanh %49 : vector<32x128xf32>
    %cst_29 = arith.constant 1.000000e+00 : f32
    %51 = vector.broadcast %cst_29 : f32 to vector<32x128xf32>
    %52 = arith.addf %51, %50 : vector<32x128xf32>
    %53 = vector.extract_strided_slice %41 {offsets = [0, 128], sizes = [32, 128], strides = [1, 1]} : vector<32x256xf32> to vector<32x128xf32>
    %54 = arith.negf %53 : vector<32x128xf32>
    %55 = math.exp %54 : vector<32x128xf32>
    %cst_30 = arith.constant 1.000000e+00 : f32
    %56 = vector.broadcast %cst_30 : f32 to vector<32x128xf32>
    %57 = arith.addf %56, %55 : vector<32x128xf32>
    %58 = arith.divf %56, %57 : vector<32x128xf32>
    %59 = arith.mulf %52, %33 : vector<32x128xf32>
    %60 = arith.addf %48, %59 : vector<32x128xf32>
    %61 = math.tanh %60 : vector<32x128xf32>
    %cst_31 = arith.constant 1.000000e+00 : f32
    %62 = vector.broadcast %cst_31 : f32 to vector<32x128xf32>
    %63 = arith.subf %62, %58 : vector<32x128xf32>
    %64 = arith.subf %61, %33 : vector<32x128xf32>
    %65 = arith.mulf %63, %64 : vector<32x128xf32>
    %66 = arith.addf %33, %65 : vector<32x128xf32>
    %67 = arith.truncf %66 : vector<32x128xf32> to vector<32x128xbf16>
    %c0_32 = arith.constant 0 : index
    %c0_33 = arith.constant 0 : index
    %68 = vector.load %arg4[%c0_32, %c0_33] : memref<128x256xbf16, #tpu.memory_space<vmem>>, vector<128x256xbf16>
    %cst_34 = arith.constant dense<0.000000e+00> : vector<32x256xf32>
    %69 = tpu.matmul %67, %68, %cst_34 {dimension_numbers = #tpu.dot_dimension_numbers<[1], [0], [0], [1], [0, 0, 1, 1], [], []>} : vector<32x128xbf16>, vector<128x256xbf16>, vector<32x256xf32> -> vector<32x256xf32>
    %c0_35 = arith.constant 0 : index
    %c0_36 = arith.constant 0 : index
    %70 = vector.load %arg5[%c0_35, %c0_36] : memref<1x256xf32, #tpu.memory_space<vmem>>, vector<1x256xf32>
    %71 = vector.broadcast %70 : vector<1x256xf32> to vector<32x256xf32>
    %72 = arith.addf %69, %71 : vector<32x256xf32>
    %73 = vector.extract_strided_slice %72 {offsets = [0, 0], sizes = [32, 128], strides = [1, 1]} : vector<32x256xf32> to vector<32x128xf32>
    %74 = vector.extract_strided_slice %72 {offsets = [0, 128], sizes = [32, 128], strides = [1, 1]} : vector<32x256xf32> to vector<32x128xf32>
    %cst_37 = arith.constant 5.000000e-01 : f32
    %75 = vector.broadcast %cst_37 : f32 to vector<32x128xf32>
    %76 = arith.mulf %75, %74 : vector<32x128xf32>
    %cst_38 = arith.constant 4.471500e-02 : f32
    %77 = vector.broadcast %cst_38 : f32 to vector<32x128xf32>
    %78 = arith.mulf %77, %74 : vector<32x128xf32>
    %79 = arith.mulf %78, %74 : vector<32x128xf32>
    %80 = arith.mulf %79, %74 : vector<32x128xf32>
    %81 = arith.addf %74, %80 : vector<32x128xf32>
    %cst_39 = arith.constant 0.797884583 : f32
    %82 = vector.broadcast %cst_39 : f32 to vector<32x128xf32>
    %83 = arith.mulf %82, %81 : vector<32x128xf32>
    %84 = math.tanh %83 : vector<32x128xf32>
    %cst_40 = arith.constant 1.000000e+00 : f32
    %85 = vector.broadcast %cst_40 : f32 to vector<32x128xf32>
    %86 = arith.addf %85, %84 : vector<32x128xf32>
    %87 = arith.mulf %76, %86 : vector<32x128xf32>
    %88 = arith.mulf %73, %87 : vector<32x128xf32>
    %c0_41 = arith.constant 0 : index
    %c0_42 = arith.constant 0 : index
    %89 = vector.load %arg6[%c0_41, %c0_42] : memref<32x128xf32, #tpu.memory_space<vmem>>, vector<32x128xf32>
    tpu.vector_store %arg6[%c0_41, %c0_42], %88 {strides = array<i32>} : memref<32x128xf32, #tpu.memory_space<vmem>>, vector<32x128xf32>,
    return
  }
  func.func @transform_0(%arg0: i32) -> (i32, i32) {
    %c0_i32 = arith.constant 0 : i32
    %c0_i32_0 = arith.constant 0 : i32
    return %arg0, %c0_i32 : i32, i32
  }
  func.func @transform_1(%arg0: i32) -> (i32, i32, i32) {
    %c0_i32 = arith.constant 0 : i32
    %c0_i32_0 = arith.constant 0 : i32
    %c0_i32_1 = arith.constant 0 : i32
    %c0_i32_2 = arith.constant 0 : i32
    return %c0_i32, %c0_i32_0, %c0_i32_1 : i32, i32, i32
  }
  func.func @transform_2(%arg0: i32) -> (i32, i32, i32) {
    %c0_i32 = arith.constant 0 : i32
    %c0_i32_0 = arith.constant 0 : i32
    %c0_i32_1 = arith.constant 0 : i32
    %c0_i32_2 = arith.constant 0 : i32
    return %c0_i32, %c0_i32_0, %c0_i32_1 : i32, i32, i32
  }
  func.func @transform_3(%arg0: i32) -> (i32, i32) {
    %c0_i32 = arith.constant 0 : i32
    %c0_i32_0 = arith.constant 0 : i32
    %c0_i32_1 = arith.constant 0 : i32
    return %c0_i32, %c0_i32_0 : i32, i32
  }
  func.func @transform_4(%arg0: i32) -> (i32, i32) {
    %c0_i32 = arith.constant 0 : i32
    %c0_i32_0 = arith.constant 0 : i32
    %c0_i32_1 = arith.constant 0 : i32
    return %c0_i32, %c0_i32_0 : i32, i32
  }
  func.func @transform_5(%arg0: i32) -> (i32, i32) {
    %c0_i32 = arith.constant 0 : i32
    %c0_i32_0 = arith.constant 0 : i32
    return %arg0, %c0_i32 : i32, i32
  }
}

</mosaic_0001>

<bundles_post_ra>
// kernel: tpu_custom_call.1
= control target key start
LH: loop header
LB: loop body
LE: loop exit
PB: predicated region body
PF: predicated region fallthrough
CT: control target
= control target key end

     0   :  { %10 = vsyncpa [#allocation3], 0  ;;  %s2198_s0 = inlined_call_operand.hbm [shape: f32[64,128], index: 0, kind: input, shape index: {}]   ;;  %s2199_s1 = inlined_call_operand.hbm [shape: bf16[2,128,384], index: 1, kind: input, shape index: {}]   ;;  %s2200_s2 = inlined_call_operand.vmem [shape: f32[2,1,384], index: 2, kind: input, shape index: {}]   ;;  %s2201_s3 = inlined_call_operand.hbm [shape: bf16[128,256], index: 3, kind: input, shape index: {}]   ;;  %s2202_s4 = inlined_call_operand.vmem [shape: f32[1,256], index: 4, kind: input, shape index: {}]   ;;  %s2203_s5 = inlined_call_operand.hbm [shape: f32[64,128], index: 5, kind: output, shape index: {}]  }
   0x1   :  { %12 = vsyncpa [#allocation3 + $0x1], 0 }
   0x2   :  { %13 = vsyncpa [#allocation6], 0 }
   0x3   :  { %14 = vsyncpa [#allocation4], 0 }
   0x4   :  { %16 = vsyncpa [#allocation4 + $0x1], 0  ;;  %s1869_s18 = smov 0   ;;  %s1871_s19 = smov 0  }
   0x5   :  { %s1873_s20 = smov 0   ;;  %s1875_s21 = smov 0  }
   0x6 LB: > { %s1890_s22 = sadd.s32 4294967295, %s1826_s21   ;;  %s1280_s23 = sadd.s32 4294967294, %s1826_s21   ;;  %s1826_s21 = sphi %s1875_s21, %s2223_s21   ;;  %s1822_s20 = sphi %s1873_s20, %s2222_s20   ;;  %s1818_s19 = sphi %s1871_s19, %s2221_s19   ;;  %s1814_s18 = sphi %s1869_s18, %s2220_s18  }
   0x7   : > { %p42_p0 = scmp.ne.s32.totalorder %s1818_s19, %s1814_s18  ;;  %p2204_p1 = scmp.eq.s32.totalorder %s1890_s22, 0 }
   0x8   : > { %p156_p3 = scmp.eq.s32.totalorder %s1280_s23, 1  ;;  %p1281_p5 = scmp.ge.s32.totalorder %s1826_s21, 1 }
   0x9   : > { %p1899_p4 = por %p2204_p1, %p42_p0  ;;  %p163_p7 = scmp.lt.s32.totalorder %s1826_s21, 3 }
   0xa   : > { %p1904_p6 = por %p156_p3, %p42_p0  ;;  %s1828_s27 = smov [#allocation5]  }
   0xb   : > { %s2207_s24 = scalar_select %p1899_p4, 1, 0 }
   0xc   : > { %s2208_s25 = scalar_select %p1904_p6, 1, 0 }
   0xd   : > { %p1909_p8 = pnand %p1281_p5, %p163_p7  ;;  %s175_s28 = sshll.u32 %s1828_s27, 4  ;;  %s1913_s28 = int_to_ptr.vmem [resolvable:$true] %s175_s28 }
   0xe   : > { %s1829_s30 = smov [#allocation7]   ;;  %s1670_s9 = scalar_lea.hbm %s2199_s1, 6144 }
   0xf   : > { %p1448_p9 = pneg %p1909_p8  ;;  %s191_s6 = sshll.u32 %s1829_s30, 4  ;;  %s1924_s6 = int_to_ptr.vmem [resolvable:$true] %s191_s6 }
  0x10   : > { %p1671_p12 = scmp.ne.s32.totalorder %s2199_s1, %s1670_s9  ;;  %p1677_p5 = scmp.lt.u32.totalorder %s1670_s9, %s2199_s1 }
  0x11   : > { %p1920_p11 = pnand %p1448_p9, %p2204_p1 }
  0x13   : > { %p1672_p13 = pneg %p1920_p11 }
  0x15   : > { %p1673_p0 = pnand %p1672_p13, %p1671_p12 }
  0x17   : > { %p1674_p3 = pneg %p1673_p0 }
  0x19   : > { %p1679_p7 = pnand %p1677_p5, %p1674_p3 }
  0x1b   : > { %1682 = shalt.err (!%p1679_p7)
}
  0x1c   : > { %s1683_s14 = scalar_lea.vmem %s1913_s28, 6144  ;;  %p1691_p2 = scmp.lt.s32.totalorder %s1913_s28, %s1913_s28 }
  0x1d   : > { %p1684_p9 = scmp.ne.s32.totalorder %s1913_s28, %s1683_s14  ;;  %p1692_p12 = scmp.lt.s32.totalorder %s1683_s14, %s1683_s14 }
  0x1f   : > { %p1686_p10 = pnand %p1684_p9, %p1672_p13  ;;  %p1693_p0 = por %p1692_p12, %p1691_p2 }
  0x21   : > { %p1687_p1 = pneg %p1686_p10 }
  0x23   : > { %p1694_p6 = pnand %p1693_p0, %p1687_p1 }
  0x25   : > { %1697 = shalt.err (!%p1694_p6)
}
  0x26   : > { %s1830_s15 = smov 192   ;;  %s1831_s16 = smov 12  }
  0x27   : > { %1451 = dma.hbm_to_vmem [thread:$0]  (!%p1920_p11), %s2199_s1, 6144, %s1913_s28, [#allocation6], %s1830_s15, %s1830_s15, %s1831_s16  }
  0x28   : > { %s1698_s7 = scalar_lea.hbm %s2201_s3, 2048 }
  0x29   : > { %p1699_p2 = scmp.ne.s32.totalorder %s2201_s3, %s1698_s7  ;;  %p1705_p10 = scmp.lt.u32.totalorder %s1698_s7, %s2201_s3 }
  0x2b   : > { %p1701_p1 = pnand %p1699_p2, %p1672_p13 }
  0x2d   : > { %p1702_p6 = pneg %p1701_p1 }
  0x2f   : > { %p1707_p3 = pnand %p1705_p10, %p1702_p6 }
  0x31   : > { %1710 = shalt.err (!%p1707_p3)
}
  0x32   : > { %s1711_s28 = scalar_lea.vmem %s1924_s6, 2048  ;;  %p1719_p12 = scmp.lt.s32.totalorder %s1924_s6, %s1924_s6 }
  0x33   : > { %p1712_p5 = scmp.ne.s32.totalorder %s1924_s6, %s1711_s28  ;;  %p1720_p0 = scmp.lt.s32.totalorder %s1711_s28, %s1711_s28 }
  0x35   : > { %p1714_p7 = pnand %p1712_p5, %p1672_p13  ;;  %p1721_p2 = por %p1720_p0, %p1719_p12 }
  0x37   : > { %p1715_p9 = pneg %p1714_p7 }
  0x39   : > { %p1722_p1 = pnand %p1721_p2, %p1715_p9 }
  0x3b   : > { %1725 = shalt.err (!%p1722_p1)
}
  0x3c   : > { %s1832_s12 = smov 128   ;;  %s1833_s13 = smov 8  }
  0x3d   : > { %1454 = dma.hbm_to_vmem [thread:$0]  (!%p1920_p11), %s2201_s3, 2048, %s1924_s6, [#allocation6], %s1832_s12, %s1832_s12, %s1833_s13  }
  0x3e   : > { %s1982_s16 = sadd.s32 1, %s1826_s21   ;;  %s29_s23 = sadd.s32 1, %s1822_s20 }
  0x3f   : > { %s26_s17 = ssub.s32 %s1826_s21, %s1982_s16  ;;  %p36_p6 = scmp.ne.s32.totalorder %s1822_s20, %s1818_s19 }
  0x40   : > { %p27_p13 = scmp.eq.s32.totalorder %s26_s17, 0  ;;  %p37_p10 = scmp.eq.s32.totalorder %s1826_s21, 0 }
  0x41   : > { %p2211_p5 = scmp.eq.s32.totalorder %s1890_s22, 1  ;;  %p1465_p9 = scmp.lt.s32.totalorder %s1826_s21, 2 }
  0x42   : > { %s1991_s27 = scalar_select %p27_p13, %s1822_s20, %s29_s23  }
  0x43   : > { %p38_p3 = por %p37_p10, %p36_p6  ;;  %p1995_p7 = por %p2211_p5, %p36_p6 }
  0x44   : > { %s208_s30 = sand.u32 1, %s1822_s20   ;;  %s1374_s6 = sshll.u32 %s1826_s21, 9 }
  0x45   : > { %s2212_s29 = scalar_select %p1995_p7, 1, 0 }
  0x46   : > { %s1285_s7 = sshll.u32 %s208_s30, 5  ;;  %s2005_s10 = scalar_lea.hbm %s2198_s0, %s1374_s6 }
  0x47   : > { %s212_s11 = scalar_lea.vmem [#allocation2], %s1285_s7  ;;  %p2009_p11 = pnand %p1465_p9, %p38_p3 }
  0x48   : > { %s219_s28 = sshll.u32 %s212_s11, 4  ;;  %s2013_s15 = scalar_lea.sflag [#allocation3], %s208_s30  ;;  %s2007_s28 = int_to_ptr.vmem [resolvable:$true] %s219_s28 }
  0x49   : > { %s1726_s17 = scalar_lea.hbm %s2005_s10, 512  ;;  %p1728_p0 = pneg %p2009_p11 }
  0x4a   : > { %p1727_p12 = scmp.ne.s32.totalorder %s2005_s10, %s1726_s17  ;;  %s1731_s6 = scalar_lea.hbm %s2198_s0, 1024 }
  0x4b   : > { %p1732_p13 = scmp.lt.u32.totalorder %s2005_s10, %s2198_s0  ;;  %p1733_p6 = scmp.lt.u32.totalorder %s1731_s6, %s1726_s17 }
  0x4c   : > { %p1729_p2 = pnand %p1728_p0, %p1727_p12  ;;  %p1735_p3 = scmp.lt.u32.totalorder %s1726_s17, %s2005_s10 }
  0x4d   : > { %p1734_p10 = por %p1733_p6, %p1732_p13 }
  0x4e   : > { %p1730_p1 = pneg %p1729_p2 }
  0x4f   : > { %p1736_p5 = por %p1735_p3, %p1734_p10 }
  0x51   : > { %p1737_p9 = pnand %p1736_p5, %p1730_p1 }
  0x53   : > { %1740 = shalt.err (!%p1737_p9)
}
  0x54   : > { %s1741_s30 = scalar_lea.vmem %s2007_s28, 512  ;;  %s1834_s11 = smov [#allocation2]  }
  0x55   : > { %p1742_p12 = scmp.ne.s32.totalorder %s2007_s28, %s1741_s30  ;;  %s1746_s23 = sshll.u32 %s1834_s11, 4  ;;  %s1747_s23 = int_to_ptr.vmem [resolvable:$false] %s1746_s23 }
  0x56   : > { %s1748_s7 = scalar_lea.vmem %s1747_s23, 1024  ;;  %p1749_p4 = scmp.lt.s32.totalorder %s2007_s28, %s1747_s23 }
  0x57   : > { %p1744_p2 = pnand %p1742_p12, %p1728_p0  ;;  %p1750_p13 = scmp.lt.s32.totalorder %s1748_s7, %s1741_s30 }
  0x59   : > { %p1745_p7 = pneg %p1744_p2  ;;  %p1751_p6 = por %p1750_p13, %p1749_p4 }
  0x5b   : > { %p1752_p10 = pnand %p1751_p6, %p1745_p7 }
  0x5d   : > { %1755 = shalt.err (!%p1752_p10)
}
  0x5e   : > { %1458 = dma.hbm_to_vmem [thread:$0]  (!%p2009_p11), %s2005_s10, 512, %s2007_s28, %s2013_s15, %s1832_s12, %s1832_s12, %s1833_s13  }
  0x5f   : > { %231 = sbr.rel (%p1909_p8) target bundleno = 929 (0x3a1), region = 40  ;;  %s2047_s17 = sand.u32 (!%p1909_p8), 1, %s1818_s19  }
  0x60   : > { %s1289_s6 = sshll.u32 (!%p1909_p8), %s2047_s17, 5  ;;  %s234_s8 = scalar_lea.sflag (!%p1909_p8), [#allocation3], %s2047_s17 }
  0x61   : > { %s2053_s14 = scalar_lea.vmem (!%p1909_p8), [#allocation2], %s1289_s6  ;;  %p2214_p4 = scmp.ne.s32.totalorder (!%p1909_p8), %s2207_s24, 0 }
  0x66   : > { %1801 = dma.done.wait (%p2214_p4), %s234_s8, 512  }
  0x67   : > { %1803 = vsyncadd (%p2214_p4), %s234_s8, 4294966784  ;;  %p2215_p7 = scmp.eq.s32.totalorder %s1890_s22, 0 }
  0x69   : > { %1805 = dma.done.wait (%p2215_p7), [#allocation6], 8192   ;;  %p2216_p8 = pmov %p2215_p7 }
  0x6a   : > { %v1835_v0 = vmov 0   ;;  %v1510_v1 = vld [vmem:[#allocation5 + $0x4] ss:$12 sps:$4 sm:$0xff]   ;;  %v1512_v2 = vld [vmem:[#allocation5] ss:$12 sps:$4 sm:$0xff]   ;;  %v2077_v23 = vld [vmem:[%s2053_s14 + $0x18] sm:$0xff]  ;;  %v299_v55 = vlaneseq }
  0x6b   : > { %1807 = vsyncadd (%p2216_p8), [#allocation6], 4294959104  ;;  %421 = vmatprep.mubr.bf16.mxu1 %v1835_v0  ;;  %766 = vmatprep.mubr.bf16.mxu0 %v1835_v0  ;;  %v1513_v3 = vld [vmem:[#allocation5 + $0x1c] ss:$12 sps:$4 sm:$0xff]   ;;  %v1515_v4 = vld [vmem:[#allocation5 + $0x18] ss:$12 sps:$4 sm:$0xff]  }
  0x6c   : > { %389 = vmatprep.subr.bf16.mxu1 %v1510_v1  ;;  %v1516_v5 = vld [vmem:[#allocation5 + $0x34] ss:$12 sps:$4 sm:$0xff]   ;;  %v1518_v6 = vld [vmem:[#allocation5 + $0x30] ss:$12 sps:$4 sm:$0xff]   ;;  %v1519_v7 = vld [vmem:[#allocation5 + $0x4c] ss:$12 sps:$4 sm:$0xff]  }
  0x6d   : > { %390 = vmatpush1.bf16.msra.mxu1 %v1512_v2  ;;  %v1521_v8 = vld [vmem:[#allocation5 + $0x48] ss:$12 sps:$4 sm:$0xff]   ;;  %v1522_v9 = vld [vmem:[#allocation5 + $0x64] ss:$12 sps:$4 sm:$0xff]   ;;  %v1524_v10 = vld [vmem:[#allocation5 + $0x60] ss:$12 sps:$4 sm:$0xff]  }
  0x6e   : > { %391 = vmatprep.subr.bf16.mxu1 %v1513_v3  ;;  %v1525_v11 = vld [vmem:[#allocation5 + $0x7c] ss:$12 sps:$4 sm:$0xff]   ;;  %v1527_v12 = vld [vmem:[#allocation5 + $0x78] ss:$12 sps:$4 sm:$0xff]   ;;  %v1528_v13 = vld [vmem:[#allocation5 + $0x94] ss:$12 sps:$4 sm:$0xff]  }
  0x6f   : > { %v1530_v14 = vld [vmem:[#allocation5 + $0x90] ss:$12 sps:$4 sm:$0xff]   ;;  %v1531_v15 = vld [vmem:[#allocation5 + $0xac] ss:$12 sps:$4 sm:$0xff]   ;;  %v1533_v16 = vld [vmem:[#allocation5 + $0xa8] ss:$12 sps:$4 sm:$0xff]  }
  0x70   : > { %v2066_v17 = vld [vmem:[%s2053_s14] sm:$0xff]  ;;  %v2069_v18 = vld [vmem:[%s2053_s14 + $0x8] sm:$0xff]  ;;  %v2074_v22 = vld [vmem:[%s2053_s14 + $0x10] sm:$0xff]  ;;  %v300_v56 = vshrl.u32 %v299_v55, 7  ;;  %s271_s23 = scalar_lea.vmem [#allocation8], %s1289_s6  ;;  %s1375_s7 = sshll.u32 %s1890_s22, 9 }
  0x71   : > { %392 = vmatpush1.bf16.msra.mxu1 %v1515_v4  ;;  %v1534_v19 = vld [vmem:[#allocation5 + $0x8] ss:$12 sps:$4 sm:$0xff]   ;;  %v279_v20 = vpack.c.bf16 %v2069_v18, %v2066_v17  ;;  %v1535_v21 = vld [vmem:[#allocation5 + $0x20] ss:$12 sps:$4 sm:$0xff]   ;;  %v1536_v24 = vld [vmem:[#allocation5 + $0x38] ss:$12 sps:$4 sm:$0xff]   ;;  %v280_v25 = vpack.c.bf16 %v2077_v23, %v2074_v22  ;;  %s2152_s24 = scalar_lea.hbm %s2203_s5, %s1375_s7 }
  0x72   : > { %393 = vmatprep.subr.bf16.mxu1 %v1516_v5  ;;  %v1537_v26 = vld [vmem:[#allocation5 + $0x50] ss:$12 sps:$4 sm:$0xff]   ;;  %v1538_v27 = vld [vmem:[#allocation5 + $0x68] ss:$12 sps:$4 sm:$0xff]   ;;  %v1539_v28 = vld [vmem:[#allocation5 + $0x80] ss:$12 sps:$4 sm:$0xff]  }
  0x73   : > { %v1540_v29 = vld [vmem:[#allocation5 + $0x98] ss:$12 sps:$4 sm:$0xff]   ;;  %v1541_v30 = vld [vmem:[#allocation5 + $0xb0] ss:$12 sps:$4 sm:$0xff]   ;;  %v1544_v32 = vld [vmem:[#allocation5 + $0xc0] ss:$12 sps:$4 sm:$0xff]  }
  0x74   : > { %v1542_v31 = vld [vmem:[#allocation5 + $0xc4] ss:$12 sps:$4 sm:$0xff]   ;;  %v1545_v33 = vld [vmem:[#allocation5 + $0xc8] ss:$12 sps:$4 sm:$0xff]   ;;  %v1549_v36 = vld [vmem:[#allocation5 + $0xe0] ss:$12 sps:$4 sm:$0xff]  }
  0x75   : > { %394 = vmatpush1.bf16.msra.mxu1 %v1518_v6  ;;  %734 = vmatprep.subr.bf16.mxu0 %v1542_v31  ;;  %v1546_v34 = vld [vmem:[#allocation5 + $0xdc] ss:$12 sps:$4 sm:$0xff]   ;;  %v1548_v35 = vld [vmem:[#allocation5 + $0xd8] ss:$12 sps:$4 sm:$0xff]   ;;  %v1550_v37 = vld [vmem:[#allocation5 + $0xf4] ss:$12 sps:$4 sm:$0xff]  }
  0x76   : > { %395 = vmatprep.subr.bf16.mxu1 %v1519_v7  ;;  %735 = vmatpush1.bf16.msra.mxu0 %v1544_v32  ;;  %v1552_v38 = vld [vmem:[#allocation5 + $0xf0] ss:$12 sps:$4 sm:$0xff]   ;;  %v1553_v39 = vld [vmem:[#allocation5 + $0xf8] ss:$12 sps:$4 sm:$0xff]   ;;  %v1556_v41 = vld [vmem:[#allocation5 + $0x108] ss:$12 sps:$4 sm:$0xff]  }
  0x77   : > { %736 = vmatprep.subr.bf16.mxu0 %v1546_v34  ;;  %v1554_v40 = vld [vmem:[#allocation5 + $0x10c] ss:$12 sps:$4 sm:$0xff]   ;;  %v1557_v42 = vld [vmem:[#allocation5 + $0x110] ss:$12 sps:$4 sm:$0xff]   ;;  %v1561_v45 = vld [vmem:[#allocation5 + $0x128] ss:$12 sps:$4 sm:$0xff]  }
  0x78   : > { %v1558_v43 = vld [vmem:[#allocation5 + $0x124] ss:$12 sps:$4 sm:$0xff]   ;;  %v1560_v44 = vld [vmem:[#allocation5 + $0x120] ss:$12 sps:$4 sm:$0xff]   ;;  %v1562_v46 = vld [vmem:[#allocation5 + $0x13c] ss:$12 sps:$4 sm:$0xff]  }
  0x79   : > { %396 = vmatpush1.bf16.msra.mxu1 %v1521_v8  ;;  %v1564_v47 = vld [vmem:[#allocation5 + $0x138] ss:$12 sps:$4 sm:$0xff]   ;;  %v1565_v48 = vld [vmem:[#allocation5 + $0x140] ss:$12 sps:$4 sm:$0xff]   ;;  %v1568_v50 = vld [vmem:[#allocation5 + $0x150] ss:$12 sps:$4 sm:$0xff]  }
  0x7a   : > { %397 = vmatprep.subr.bf16.mxu1 %v1522_v9  ;;  %737 = vmatpush1.bf16.msra.mxu0 %v1548_v35  ;;  %v1566_v49 = vld [vmem:[#allocation5 + $0x154] ss:$12 sps:$4 sm:$0xff]   ;;  %v1569_v51 = vld [vmem:[#allocation5 + $0x158] ss:$12 sps:$4 sm:$0xff]   ;;  %v1573_v54 = vld [vmem:[#allocation5 + $0x170] ss:$12 sps:$4 sm:$0xff]  }
  0x7b   : > { %738 = vmatprep.subr.bf16.mxu0 %v1550_v37  ;;  %v1570_v52 = vld [vmem:[#allocation5 + $0x16c] ss:$12 sps:$4 sm:$0xff]   ;;  %v1572_v53 = vld [vmem:[#allocation5 + $0x168] ss:$12 sps:$4 sm:$0xff]   ;;  %v2082_v57 = vsub.s32 0, %v300_v56  ;;  %v2087_v60 = vsub.s32 1, %v300_v56 }
  0x7c   : > { %v297_v59 = vld [vmem:[%s2200_s2] sm:$0x3]  ;;  %s1188_s8 = sshll.u32 %s271_s23, 4  ;;  %s1175_s26 = scalar_lea.sflag [#allocation4], %s2047_s17  ;;  %s2154_s8 = int_to_ptr.vmem [resolvable:$true] %s1188_s8 }
  0x7d   : > { %398 = vmatpush1.bf16.msra.mxu1 %v1524_v10  ;;  %v302_v1 = vrot.slane %v297_v59, %v2082_v57  ;;  %v306_v2 = vrot.slane %v297_v59, %v2087_v60  ;;  %s1756_s12 = scalar_lea.vmem %s2154_s8, 512  ;;  %p2217_p0 = scmp.ne.s32.totalorder %s2212_s29, 0 }
  0x7e   : > { %399 = vmatprep.subr.bf16.mxu1 %v1525_v11  ;;  %739 = vmatpush1.bf16.msra.mxu0 %v1552_v38  ;;  %p1757_p11 = scmp.ne.s32.totalorder %s2154_s8, %s1756_s12  ;;  %s1836_s22 = smov [#allocation8]  }
  0x7f   : > { %740 = vmatprep.subr.bf16.mxu0 %v1554_v40  ;;  %s1760_s13 = sshll.u32 %s1836_s22, 4  ;;  %s1761_s13 = int_to_ptr.vmem [resolvable:$false] %s1760_s13 }
  0x80   : > { %p1758_p1 = pnand %p1757_p11, %p2217_p0  ;;  %s1762_s10 = scalar_lea.vmem %s1761_s13, 1024 }
  0x81   : > { %400 = vmatpush1.bf16.msra.mxu1 %v1527_v12  ;;  %p1763_p5 = scmp.lt.s32.totalorder %s2154_s8, %s1761_s13  ;;  %p1764_p9 = scmp.lt.s32.totalorder %s1762_s10, %s1756_s12 }
  0x82   : > { %401 = vmatprep.subr.bf16.mxu1 %v1528_v13  ;;  %741 = vmatpush1.bf16.msra.mxu0 %v1556_v41  ;;  %p1759_p3 = pneg %p1758_p1 }
  0x83   : > { %742 = vmatprep.subr.bf16.mxu0 %v1558_v43  ;;  %p1765_p12 = por %p1764_p9, %p1763_p5 }
  0x85   : > { %402 = vmatpush1.bf16.msra.mxu1 %v1530_v14  ;;  %p1766_p2 = pnand %p1765_p12, %p1759_p3 }
  0x86   : > { %403 = vmatprep.subr.bf16.mxu1 %v1531_v15  ;;  %743 = vmatpush1.bf16.msra.mxu0 %v1560_v44 }
  0x87   : > { %744 = vmatprep.subr.bf16.mxu0 %v1562_v46 }
  0x89   : > { %404 = vmatpush1.bf16.msra.mxu1 %v1533_v16 }
  0x8a   : > { %1396 = vmatprep.subr.bf16.mxu1 %v1534_v19  ;;  %745 = vmatpush1.bf16.msra.mxu0 %v1564_v47 }
  0x8b   : > { %746 = vmatprep.subr.bf16.mxu0 %v1566_v49 }
  0x8c   : > { %422 = vmatmul.mubr.bf16.vlgmr.msra.gmra.mrb[0].mxu1 %v279_v20 }
  0x8d   : > { %1397 = vmatpush3.bf16.msra.mxu1 %v1534_v19  ;;  %431 = vmatprep.mubr.bf16.mxu1 %v1835_v0 }
  0x8e   : > { %1398 = vmatprep.subr.bf16.mxu1 %v1535_v21  ;;  %747 = vmatpush1.bf16.msra.mxu0 %v1568_v50 }
  0x8f   : > { %748 = vmatprep.subr.bf16.mxu0 %v1570_v52 }
  0x91   : > { %1399 = vmatpush3.bf16.msra.mxu1 %v1535_v21 }
  0x92   : > { %1400 = vmatprep.subr.bf16.mxu1 %v1536_v24  ;;  %749 = vmatpush1.bf16.msra.mxu0 %v1572_v53 }
  0x94   : > { %432 = vmatmul.mubr.bf16.gmra.mrb[4].mxu1 %v280_v25 }
  0x95   : > { %1401 = vmatpush3.bf16.msra.mxu1 %v1536_v24  ;;  %1412 = vmatprep.mubr.bf16.mxu1 %v279_v20 }
  0x96   : > { %1402 = vmatprep.subr.bf16.mxu1 %v1537_v26 }
  0x99   : > { %1403 = vmatpush3.bf16.msra.mxu1 %v1537_v26 }
  0x9a   : > { %1404 = vmatprep.subr.bf16.mxu1 %v1538_v27 }
  0x9d   : > { %1405 = vmatpush3.bf16.msra.mxu1 %v1538_v27 }
  0x9e   : > { %1406 = vmatprep.subr.bf16.mxu1 %v1539_v28 }
  0xa1   : > { %1407 = vmatpush3.bf16.msra.mxu1 %v1539_v28 }
  0xa2   : > { %1408 = vmatprep.subr.bf16.mxu1 %v1540_v29 }
  0xa5   : > { %1409 = vmatpush3.bf16.msra.mxu1 %v1540_v29 }
  0xa6   : > { %1410 = vmatprep.subr.bf16.mxu1 %v1541_v30 }
  0xa9   : > { %1411 = vmatpush3.bf16.msra.mxu1 %v1541_v30 }
  0xaa   : > { %1416 = vmatprep.subr.bf16.mxu1 %v1545_v33 }
  0xac   : > { %1413 = vmatmul.mubr.bf16.vlgmr.msra.gmra.mrb[8].mxu1 %v280_v25 }
  0xad   : > { %1417 = vmatpush3.bf16.msra.mxu1 %v1545_v33 }
  0xae   : > { %1418 = vmatprep.subr.bf16.mxu1 %v1549_v36 }
  0xb1   : > { %1419 = vmatpush3.bf16.msra.mxu1 %v1549_v36  ;;  %v1309_v36 = vld [vmem:[%s2200_s2 + $0x2] ss:$0 sm:$0xff] }
  0xb2   : > { %1420 = vmatprep.subr.bf16.mxu1 %v1553_v39 }
  0xb5   : > { %1421 = vmatpush3.bf16.msra.mxu1 %v1553_v39 }
  0xb6   : > { %1422 = vmatprep.subr.bf16.mxu1 %v1557_v42 }
  0xb9   : > { %1423 = vmatpush3.bf16.msra.mxu1 %v1557_v42 }
  0xba   : > { %1424 = vmatprep.subr.bf16.mxu1 %v1561_v45 }
  0xbd   : > { %1425 = vmatpush3.bf16.msra.mxu1 %v1561_v45 }
  0xbe   : > { %1426 = vmatprep.subr.bf16.mxu1 %v1565_v48 }
  0xc1   : > { %1427 = vmatpush3.bf16.msra.mxu1 %v1565_v48 }
  0xc2   : > { %1428 = vmatprep.subr.bf16.mxu1 %v1569_v51 }
  0xc5   : > { %1429 = vmatpush3.bf16.msra.mxu1 %v1569_v51 }
  0xc6   : > { %1430 = vmatprep.subr.bf16.mxu1 %v1573_v54 }
  0xc9   : > { %1431 = vmatpush3.bf16.msra.mxu1 %v1573_v54 }
 0x15f   : > { %v423_v58 = vpop.f32.mrb[0].mxu1 }
 0x160   : > { %v425_v61 = vpop.f32.mrb[1].mxu1  ;;  %v424_v3 = vadd.f32 %v423_v58, %v302_v1 }
 0x161   : > { %v427_v62 = vpop.f32.mrb[2].mxu1  ;;  %v426_v5 = vadd.f32 %v425_v61, %v306_v2 }
 0x162   : > { %v429_v63 = vpop.f32.mrb[3].mxu1  ;;  %v428_v6 = vadd.f32 %v427_v62, %v302_v1  ;;  %1598 = vtanh.f32 %v424_v3 }
 0x163   : > { %v430_v11 = vadd.f32 %v429_v63, %v306_v2  ;;  %v1318_v16 = vmul.f32 -1.442695, %v426_v5 }
 0x164   : > { %1600 = vtanh.f32 %v428_v6 }
 0x165   : > { %v1319_v20 = vmul.f32 -1.442695, %v430_v11 }
 0x167   : > { %v433_v4 = vpop.f32.mrb[4].mxu1 }
 0x168   : > { %v435_v7 = vpop.f32.mrb[5].mxu1  ;;  %v434_v8 = vadd.f32 %v433_v4, %v302_v1 }
 0x169   : > { %v436_v9 = vadd.f32 %v435_v7, %v306_v2  ;;  %v437_v10 = vpop.f32.mrb[6].mxu1 }
 0x16a   : > { %v438_v12 = vadd.f32 %v437_v10, %v302_v1  ;;  %v439_v13 = vpop.f32.mrb[7].mxu1  ;;  %1602 = vtanh.f32 %v434_v8 }
 0x16b   : > { %v1320_v14 = vmul.f32 -1.442695, %v436_v9  ;;  %v440_v15 = vadd.f32 %v439_v13, %v306_v2 }
 0x16c   : > { %1604 = vtanh.f32 %v438_v12  ;;  %v1599_v21 = vpop.eup %1598 }
 0x16d   : > { %v1321_v19 = vmul.f32 -1.442695, %v440_v15  ;;  %1606 = vpow2.f32 %v1320_v14  ;;  %v566_v34 = vadd.f32 1.0, %v1599_v21 }
 0x16e   : > { %1608 = vpow2.f32 %v1318_v16  ;;  %v1601_v24 = vpop.eup %1600 }
 0x16f   : > { %1610 = vpow2.f32 %v1321_v19  ;;  %v567_v39 = vadd.f32 1.0, %v1601_v24  ;;  %v594_v46 = vmul.f32 %v566_v34, %v2066_v17  ;;  %v1592_v34 = vld [vmem:[#allocation7 + $0x60] ss:$8 sps:$4 sm:$0xff]  }
 0x170   : > { %1612 = vpow2.f32 %v1319_v20 }
 0x171   : > { %v595_v53 = vmul.f32 %v567_v39, %v2069_v18 }
 0x174   : > { %v1603_v25 = vpop.eup %1602 }
 0x175   : > { %v568_v29 = vadd.f32 1.0, %v1603_v25  ;;  %v1582_v25 = vld [vmem:[#allocation7 + $0x24] ss:$8 sps:$4 sm:$0xff]  }
 0x176   : > { %v1605_v26 = vpop.eup %1604 }
 0x177   : > { %v1607_v27 = vpop.eup %1606  ;;  %v569_v33 = vadd.f32 1.0, %v1605_v26  ;;  %v596_v38 = vmul.f32 %v568_v29, %v2074_v22  ;;  %v1580_v26 = vld [vmem:[#allocation7 + $0x20] ss:$8 sps:$4 sm:$0xff]   ;;  %v1588_v29 = vld [vmem:[#allocation7 + $0x44] ss:$8 sps:$4 sm:$0xff]  }
 0x178   : > { %v1609_v28 = vpop.eup %1608  ;;  %v584_v32 = vadd.f32 1.0, %v1607_v27  ;;  %v1585_v27 = vld [vmem:[#allocation7 + $0x34] ss:$8 sps:$4 sm:$0xff]  }
 0x179   : > { %v1611_v30 = vpop.eup %1610  ;;  %v582_v35 = vadd.f32 1.0, %v1609_v28  ;;  %v597_v44 = vmul.f32 %v569_v33, %v2077_v23  ;;  %v1583_v28 = vld [vmem:[#allocation7 + $0x30] ss:$8 sps:$4 sm:$0xff]   ;;  %v1594_v33 = vld [vmem:[#allocation7 + $0x64] ss:$8 sps:$4 sm:$0xff]  }
 0x17a   : > { %v1613_v31 = vpop.eup %1612  ;;  %v585_v37 = vadd.f32 1.0, %v1611_v30  ;;  %1614 = vrcp.f32 %v584_v32  ;;  %v1586_v30 = vld [vmem:[#allocation7 + $0x40] ss:$8 sps:$4 sm:$0xff]   ;;  %v1589_v32 = vld [vmem:[#allocation7 + $0x50] ss:$8 sps:$4 sm:$0xff]  }
 0x17b   : > { %v583_v40 = vadd.f32 1.0, %v1613_v31  ;;  %1616 = vrcp.f32 %v582_v35  ;;  %v1591_v31 = vld [vmem:[#allocation7 + $0x54] ss:$8 sps:$4 sm:$0xff]  }
 0x17c   : > { %1618 = vrcp.f32 %v585_v37  ;;  %v1597_v35 = vld [vmem:[#allocation7 + $0x74] ss:$8 sps:$4 sm:$0xff]   ;;  %v1322_v37 = vld [vmem:[%s2200_s2 + $0x3] sm:$0x3] }
 0x17d   : > { %1620 = vrcp.f32 %v583_v40  ;;  %v651_v39 = vrot.slane %v1322_v37, %v2087_v60 }
 0x17f   : > { %v1414_v41 = vpop.f32.mrb[8].mxu1 }
 0x180   : > { %v556_v42 = vadd.f32 %v1414_v41, %v1309_v36  ;;  %v547_v43 = vpop.f32.mrb[9].mxu1 }
 0x181   : > { %v548_v45 = vadd.f32 %v1309_v36, %v547_v43  ;;  %v1415_v47 = vpop.f32.mrb[10].mxu1 }
 0x182   : > { %v600_v48 = vadd.f32 %v596_v38, %v556_v42  ;;  %v559_v49 = vadd.f32 %v1415_v47, %v1309_v36  ;;  %v550_v50 = vpop.f32.mrb[11].mxu1  ;;  %v647_v38 = vrot.slane %v1322_v37, %v2082_v57 }
 0x183   : > { %v598_v51 = vadd.f32 %v594_v46, %v548_v45  ;;  %v551_v52 = vadd.f32 %v1309_v36, %v550_v50  ;;  %v1595_v36 = vld [vmem:[#allocation7 + $0x70] ss:$8 sps:$4 sm:$0xff]  }
 0x184   : > { %1622 = vtanh.f32 %v600_v48  ;;  %v601_v54 = vadd.f32 %v597_v44, %v559_v49  ;;  %v1615_v56 = vpop.eup %1614 }
 0x185   : > { %1624 = vtanh.f32 %v598_v51  ;;  %v599_v55 = vadd.f32 %v595_v53, %v551_v52  ;;  %v1617_v58 = vpop.eup %1616  ;;  %v608_v62 = vsub.f32 1.0, %v1615_v56 }
 0x186   : > { %1626 = vtanh.f32 %v601_v54  ;;  %v1619_v59 = vpop.eup %1618  ;;  %v606_v5 = vsub.f32 1.0, %v1617_v58 }
 0x187   : > { %1628 = vtanh.f32 %v599_v55  ;;  %v1621_v61 = vpop.eup %1620  ;;  %v609_v2 = vsub.f32 1.0, %v1619_v59 }
 0x188   : > { %v607_v10 = vsub.f32 1.0, %v1621_v61 }
 0x18e   : > { %v1623_v63 = vpop.eup %1622 }
 0x18f   : > { %v1625_v1 = vpop.eup %1624  ;;  %v612_v3 = vsub.f32 %v1623_v63, %v2074_v22 }
 0x190   : > { %v1627_v4 = vpop.eup %1626  ;;  %v610_v6 = vsub.f32 %v1625_v1, %v2066_v17 }
 0x191   : > { %v1629_v7 = vpop.eup %1628  ;;  %v616_v8 = vmul.f32 %v612_v3, %v608_v62  ;;  %v613_v9 = vsub.f32 %v1627_v4, %v2077_v23  ;;  %v1340_v3 = vld [vmem:[%s2200_s2 + $0x5] ss:$0 sm:$0xff] }
 0x192   : > { %v611_v11 = vsub.f32 %v1629_v7, %v2069_v18  ;;  %v614_v12 = vmul.f32 %v610_v6, %v606_v5 }
 0x193   : > { %v617_v13 = vmul.f32 %v613_v9, %v609_v2  ;;  %v2112_v20 = vadd.f32 %v616_v8, %v2074_v22  ;;  %v1579_v22 = vld [vmem:[#allocation7 + $0x14] ss:$8 sps:$4 sm:$0xff]  }
 0x194   : > { %v615_v14 = vmul.f32 %v611_v11, %v607_v10  ;;  %v2106_v16 = vadd.f32 %v614_v12, %v2066_v17  ;;  %v1576_v17 = vld [vmem:[#allocation7 + $0x4] ss:$8 sps:$4 sm:$0xff]  }
 0x195   : > { %v2103_v15 = vadd.f32 %v617_v13, %v2077_v23  ;;  %1077 = vmatprep.subr.bf16.mxu0 %v1576_v17  ;;  %v1577_v23 = vld [vmem:[#allocation7 + $0x10] ss:$8 sps:$4 sm:$0xff]  }
 0x196   : > { %v2109_v19 = vadd.f32 %v615_v14, %v2069_v18  ;;  %v1574_v18 = vld [vmem:[#allocation7] ss:$8 sps:$4 sm:$0xff]  }
 0x197   : > { %v623_v24 = vpack.c.bf16 %v2103_v15, %v2112_v20 }
 0x198   : > { %v622_v21 = vpack.c.bf16 %v2109_v19, %v2106_v16 }
 0x19a   : > { %767 = vmatmul.mubr.bf16.vlgmr.msra.gmra.mrb[0].mxu0 %v622_v21  ;;  %1432 = vmatprep.mubr.bf16.mxu1 %v622_v21 }
 0x19b   : > { %1433 = vmatmul.mubr.bf16.vlgmr.msra.gmra.mrb[12].mxu1 %v623_v24  ;;  %776 = vmatprep.mubr.bf16.mxu0 %v1835_v0 }
 0x19c   : > { %1078 = vmatpush1.bf16.msra.mxu0 %v1574_v18 }
 0x19d   : > { %1079 = vmatprep.subr.bf16.mxu0 %v1579_v22 }
 0x1a0   : > { %1080 = vmatpush1.bf16.msra.mxu0 %v1577_v23 }
 0x1a1   : > { %1081 = vmatprep.subr.bf16.mxu0 %v1582_v25 }
 0x1a2   : > { %777 = vmatmul.mubr.bf16.gmra.mrb[4].mxu0 %v623_v24 }
 0x1a3   : > { %1109 = vmatprep.mubr.bf16.mxu0 %v1835_v0 }
 0x1a4   : > { %1082 = vmatpush1.bf16.msra.mxu0 %v1580_v26 }
 0x1a5   : > { %1083 = vmatprep.subr.bf16.mxu0 %v1585_v27 }
 0x1a8   : > { %1084 = vmatpush1.bf16.msra.mxu0 %v1583_v28 }
 0x1a9   : > { %1085 = vmatprep.subr.bf16.mxu0 %v1588_v29 }
 0x1ac   : > { %1086 = vmatpush1.bf16.msra.mxu0 %v1586_v30 }
 0x1ad   : > { %1087 = vmatprep.subr.bf16.mxu0 %v1591_v31 }
 0x1b0   : > { %1088 = vmatpush1.bf16.msra.mxu0 %v1589_v32 }
 0x1b1   : > { %1089 = vmatprep.subr.bf16.mxu0 %v1594_v33 }
 0x1b4   : > { %1090 = vmatpush1.bf16.msra.mxu0 %v1592_v34 }
 0x1b5   : > { %1091 = vmatprep.subr.bf16.mxu0 %v1597_v35 }
 0x1b8   : > { %1092 = vmatpush1.bf16.msra.mxu0 %v1595_v36 }
 0x26d   : > { %v768_v40 = vpop.f32.mrb[0].mxu0 }
 0x26e   : > { %v769_v41 = vadd.f32 %v768_v40, %v647_v38  ;;  %v770_v42 = vpop.f32.mrb[1].mxu0  ;;  %v1434_v43 = vpop.f32.mrb[12].mxu1 }
 0x26f   : > { %v771_v44 = vadd.f32 %v770_v42, %v651_v39  ;;  %v772_v45 = vpop.f32.mrb[2].mxu0  ;;  %v892_v46 = vpop.f32.mrb[13].mxu1  ;;  %v901_v26 = vadd.f32 %v1434_v43, %v1340_v3 }
 0x270   : > { %1630 = vtanh.f32 %v769_v41  ;;  %v773_v47 = vadd.f32 %v772_v45, %v647_v38  ;;  %v774_v48 = vpop.f32.mrb[3].mxu0  ;;  %v1435_v49 = vpop.f32.mrb[14].mxu1  ;;  %v893_v9 = vadd.f32 %v1340_v3, %v892_v46 }
 0x271   : > { %v1349_v50 = vmul.f32 -1.442695, %v771_v44  ;;  %v775_v51 = vadd.f32 %v774_v48, %v651_v39  ;;  %v895_v52 = vpop.f32.mrb[15].mxu1  ;;  %v904_v31 = vadd.f32 %v1435_v49, %v1340_v3 }
 0x272   : > { %1632 = vtanh.f32 %v773_v47  ;;  %v896_v14 = vadd.f32 %v1340_v3, %v895_v52 }
 0x273   : > { %1634 = vpow2.f32 %v1349_v50  ;;  %v1350_v53 = vmul.f32 -1.442695, %v775_v51 }
 0x275   : > { %1636 = vpow2.f32 %v1350_v53  ;;  %v778_v54 = vpop.f32.mrb[4].mxu0 }
 0x276   : > { %v779_v55 = vadd.f32 %v778_v54, %v647_v38  ;;  %v780_v56 = vpop.f32.mrb[5].mxu0 }
 0x277   : > { %v781_v58 = vadd.f32 %v780_v56, %v651_v39  ;;  %v782_v59 = vpop.f32.mrb[6].mxu0 }
 0x278   : > { %1638 = vtanh.f32 %v779_v55  ;;  %v783_v61 = vadd.f32 %v782_v59, %v647_v38  ;;  %v784_v62 = vpop.f32.mrb[7].mxu0 }
 0x279   : > { %v1351_v63 = vmul.f32 -1.442695, %v781_v58  ;;  %v785_v1 = vadd.f32 %v784_v62, %v651_v39  ;;  %v985_v62 = vld [vmem:[%s2202_s4] sm:$0x3] }
 0x27a   : > { %v1631_v2 = vpop.eup %1630  ;;  %1640 = vtanh.f32 %v783_v61 }
 0x27b   : > { %v911_v4 = vadd.f32 1.0, %v1631_v2  ;;  %1642 = vpow2.f32 %v1351_v63  ;;  %v1352_v5 = vmul.f32 -1.442695, %v785_v1  ;;  %v994_v63 = vrot.slane %v985_v62, %v2087_v60 }
 0x27c   : > { %v1633_v6 = vpop.eup %1632 }
 0x27d   : > { %v1635_v7 = vpop.eup %1634  ;;  %v912_v8 = vadd.f32 1.0, %v1633_v6  ;;  %v939_v10 = vmul.f32 %v911_v4, %v2106_v16  ;;  %1644 = vpow2.f32 %v1352_v5 }
 0x27e   : > { %v927_v11 = vadd.f32 1.0, %v1635_v7 }
 0x27f   : > { %v1637_v12 = vpop.eup %1636  ;;  %v943_v13 = vadd.f32 %v939_v10, %v893_v9  ;;  %v940_v21 = vmul.f32 %v912_v8, %v2109_v19 }
 0x280   : > { %1646 = vrcp.f32 %v927_v11  ;;  %v928_v24 = vadd.f32 1.0, %v1637_v12 }
 0x281   : > { %1648 = vtanh.f32 %v943_v13  ;;  %v944_v17 = vadd.f32 %v940_v21, %v896_v14 }
 0x282   : > { %v1639_v18 = vpop.eup %1638  ;;  %1650 = vrcp.f32 %v928_v24 }
 0x283   : > { %1652 = vtanh.f32 %v944_v17  ;;  %v913_v22 = vadd.f32 1.0, %v1639_v18 }
 0x284   : > { %v1641_v23 = vpop.eup %1640 }
 0x285   : > { %v1643_v25 = vpop.eup %1642  ;;  %v941_v27 = vmul.f32 %v913_v22, %v2112_v20  ;;  %v914_v28 = vadd.f32 1.0, %v1641_v23 }
 0x286   : > { %v929_v29 = vadd.f32 1.0, %v1643_v25 }
 0x287   : > { %v1645_v30 = vpop.eup %1644  ;;  %v945_v32 = vadd.f32 %v941_v27, %v901_v26  ;;  %v942_v33 = vmul.f32 %v914_v28, %v2103_v15 }
 0x288   : > { %1654 = vrcp.f32 %v929_v29  ;;  %v930_v34 = vadd.f32 1.0, %v1645_v30 }
 0x289   : > { %1656 = vtanh.f32 %v945_v32  ;;  %v946_v35 = vadd.f32 %v942_v33, %v904_v31  ;;  %v990_v32 = vrot.slane %v985_v62, %v2082_v57 }
 0x28a   : > { %v1647_v36 = vpop.eup %1646  ;;  %1658 = vrcp.f32 %v930_v34 }
 0x28b   : > { %v1649_v37 = vpop.eup %1648  ;;  %v951_v38 = vsub.f32 1.0, %v1647_v36  ;;  %1660 = vtanh.f32 %v946_v35 }
 0x28c   : > { %v1651_v39 = vpop.eup %1650  ;;  %v955_v40 = vsub.f32 %v1649_v37, %v2106_v16 }
 0x28d   : > { %v1653_v41 = vpop.eup %1652  ;;  %v952_v42 = vsub.f32 1.0, %v1651_v39 }
 0x28e   : > { %v956_v43 = vsub.f32 %v1653_v41, %v2109_v19  ;;  %v959_v44 = vmul.f32 %v955_v40, %v951_v38 }
 0x290   : > { %v960_v45 = vmul.f32 %v956_v43, %v952_v42  ;;  %v963_v47 = vadd.f32 %v959_v44, %v2106_v16 }
 0x292   : > { %v1655_v46 = vpop.eup %1654  ;;  %v964_v48 = vadd.f32 %v960_v45, %v2109_v19 }
 0x293   : > { %v1657_v49 = vpop.eup %1656  ;;  %v953_v50 = vsub.f32 1.0, %v1655_v46 }
 0x294   : > { %v1659_v51 = vpop.eup %1658  ;;  %v967_v52 = vpack.c.bf16 %v964_v48, %v963_v47  ;;  %v957_v53 = vsub.f32 %v1657_v49, %v2112_v20 }
 0x295   : > { %v1661_v54 = vpop.eup %1660  ;;  %v954_v55 = vsub.f32 1.0, %v1659_v51 }
 0x296   : > { %1110 = vmatmul.mubr.bf16.vlgmr.msra.gmra.mrb[8].mxu0 %v967_v52  ;;  %v958_v56 = vsub.f32 %v1661_v54, %v2103_v15  ;;  %v961_v58 = vmul.f32 %v957_v53, %v953_v50 }
 0x297   : > { %1119 = vmatprep.mubr.bf16.mxu0 %v1835_v0 }
 0x298   : > { %v962_v59 = vmul.f32 %v958_v56, %v954_v55  ;;  %v965_v61 = vadd.f32 %v961_v58, %v2112_v20 }
 0x29a   : > { %v966_v16 = vadd.f32 %v962_v59, %v2103_v15 }
 0x29c   : > { %v968_v19 = vpack.c.bf16 %v966_v16, %v965_v61 }
 0x29e   : > { %1120 = vmatmul.mubr.bf16.gmra.mrb[12].mxu0 %v968_v19 }
 0x369   : > { %v1111_v1 = vpop.f32.mrb[8].mxu0 }
 0x36a   : > { %v1113_v2 = vpop.f32.mrb[9].mxu0  ;;  %v1112_v38 = vadd.f32 %v1111_v1, %v990_v32 }
 0x36b   : > { %v1114_v3 = vadd.f32 %v1113_v2, %v994_v63  ;;  %v1115_v4 = vpop.f32.mrb[10].mxu0 }
 0x36c   : > { %v1117_v5 = vpop.f32.mrb[11].mxu0  ;;  %v1116_v43 = vadd.f32 %v1115_v4, %v990_v32 }
 0x36d   : > { %v1134_v6 = vmul.f32 0.044715, %v1114_v3  ;;  %v1118_v0 = vadd.f32 %v1117_v5, %v994_v63  ;;  %v1130_v35 = vmul.f32 0.5, %v1114_v3 }
 0x36f   : > { %v1138_v7 = vmul.f32 %v1134_v6, %v1114_v3  ;;  %v1135_v8 = vmul.f32 0.044715, %v1118_v0  ;;  %v1131_v40 = vmul.f32 0.5, %v1118_v0 }
 0x371   : > { %v1142_v20 = vmul.f32 %v1138_v7, %v1114_v3  ;;  %v1139_v9 = vmul.f32 %v1135_v8, %v1118_v0  ;;  %v1121_v15 = vpop.f32.mrb[12].mxu0 }
 0x372   : > { %v1123_v10 = vpop.f32.mrb[13].mxu0  ;;  %v1122_v49 = vadd.f32 %v1121_v15, %v990_v32 }
 0x373   : > { %v1146_v11 = vadd.f32 %v1142_v20, %v1114_v3  ;;  %v1143_v12 = vmul.f32 %v1139_v9, %v1118_v0  ;;  %v1124_v13 = vadd.f32 %v1123_v10, %v994_v63  ;;  %v1125_v14 = vpop.f32.mrb[14].mxu0 }
 0x374   : > { %v1127_v21 = vpop.f32.mrb[15].mxu0  ;;  %v1126_v54 = vadd.f32 %v1125_v14, %v990_v32 }
 0x375   : > { %v1150_v24 = vmul.f32 0.7978846, %v1146_v11  ;;  %v1147_v60 = vadd.f32 %v1143_v12, %v1118_v0  ;;  %v1136_v17 = vmul.f32 0.044715, %v1124_v13  ;;  %v1128_v18 = vadd.f32 %v1127_v21, %v994_v63 }
 0x376   : > { %v1132_v57 = vmul.f32 0.5, %v1124_v13 }
 0x377   : > { %1662 = vtanh.f32 %v1150_v24  ;;  %v1151_v22 = vmul.f32 0.7978846, %v1147_v60  ;;  %v1140_v23 = vmul.f32 %v1136_v17, %v1124_v13  ;;  %v1137_v25 = vmul.f32 0.044715, %v1128_v18 }
 0x378   : > { %v1133_v51 = vmul.f32 0.5, %v1128_v18 }
 0x379   : > { %1664 = vtanh.f32 %v1151_v22  ;;  %v1144_v26 = vmul.f32 %v1140_v23, %v1124_v13  ;;  %v1141_v27 = vmul.f32 %v1137_v25, %v1128_v18 }
 0x37b   : > { %v1148_v28 = vadd.f32 %v1144_v26, %v1124_v13  ;;  %v1145_v29 = vmul.f32 %v1141_v27, %v1128_v18 }
 0x37d   : > { %v1152_v30 = vmul.f32 0.7978846, %v1148_v28  ;;  %v1149_v31 = vadd.f32 %v1145_v29, %v1128_v18 }
 0x37f   : > { %1666 = vtanh.f32 %v1152_v30  ;;  %v1153_v33 = vmul.f32 0.7978846, %v1149_v31 }
 0x381   : > { %v1663_v34 = vpop.eup %1662  ;;  %1668 = vtanh.f32 %v1153_v33 }
 0x382   : > { %v1158_v36 = vadd.f32 1.0, %v1663_v34 }
 0x383   : > { %v1665_v37 = vpop.eup %1664 }
 0x384   : > { %v1162_v39 = vmul.f32 %v1158_v36, %v1130_v35  ;;  %v1159_v41 = vadd.f32 1.0, %v1665_v37 }
 0x386   : > { %v1166_v42 = vmul.f32 %v1162_v39, %v1112_v38  ;;  %v1163_v44 = vmul.f32 %v1159_v41, %v1131_v40 }
 0x388   : > { %1170 = vst [vmem:[%s271_s23] sm:$0xff] %v1166_v42  ;;  %v1167_v45 = vmul.f32 %v1163_v44, %v1116_v43 }
 0x389   : > { %v1667_v46 = vpop.eup %1666 }
 0x38a   : > { %1171 = vst [vmem:[%s271_s23 + $0x8] sm:$0xff] %v1167_v45  ;;  %v1160_v47 = vadd.f32 1.0, %v1667_v46 }
 0x38b   : > { %v1669_v48 = vpop.eup %1668 }
 0x38c   : > { %v1164_v50 = vmul.f32 %v1160_v47, %v1132_v57  ;;  %v1161_v52 = vadd.f32 1.0, %v1669_v48 }
 0x38e   : > { %v1168_v53 = vmul.f32 %v1164_v50, %v1122_v49  ;;  %v1165_v55 = vmul.f32 %v1161_v52, %v1133_v51 }
 0x390   : > { %1172 = vst [vmem:[%s271_s23 + $0x10] sm:$0xff] %v1168_v53  ;;  %v1169_v56 = vmul.f32 %v1165_v55, %v1126_v54 }
 0x392   : > { %1173 = vst [vmem:[%s271_s23 + $0x18] sm:$0xff] %v1169_v56 }
 0x393   : > { %1769 = shalt.err (!%p1766_p2)
}
 0x394   : > { %s1770_s28 = scalar_lea.hbm %s2152_s24, 512  ;;  %s1774_s30 = scalar_lea.hbm %s2203_s5, 1024 }
 0x395   : > { %p1771_p13 = scmp.ne.s32.totalorder %s2152_s24, %s1770_s28  ;;  %p1775_p4 = scmp.lt.u32.totalorder %s2152_s24, %s2203_s5 }
 0x396   : > { %p1776_p7 = scmp.lt.u32.totalorder %s1774_s30, %s1770_s28  ;;  %p1778_p11 = scmp.lt.u32.totalorder %s1770_s28, %s2152_s24 }
 0x397   : > { %p1772_p6 = pnand %p1771_p13, %p2217_p0 }
 0x398   : > { %p1777_p8 = por %p1776_p7, %p1775_p4 }
 0x399   : > { %p1773_p10 = pneg %p1772_p6 }
 0x39a   : > { %p1779_p1 = por %p1778_p11, %p1777_p8 }
 0x39c   : > { %p1780_p3 = pnand %p1779_p1, %p1773_p10 }
 0x39e   : > { %1783 = shalt.err (!%p1780_p3)
}
 0x39f   : > { %s1837_s7 = smov 128   ;;  %s1838_s6 = smov 8  }
 0x3a0   : > { %1446 = dma.vmem_to_hbm [thread:$0]  (%p2217_p0), %s2154_s8, 512, %s2152_s24, %s1175_s26, %s1837_s7, %s1837_s7, %s1838_s6  }
 0x3a1 PF: > { %s1203_s14 = sand.u32 1, %s1814_s18   ;;  %p2218_p5 = scmp.ne.s32.totalorder %s2208_s25, 0 }
 0x3a2   : > { %p2219_p9 = scmp.ge.s32.totalorder %s1826_s21, 2  ;;  %s1204_s12 = scalar_lea.sflag [#allocation4], %s1203_s14 }
 0x3a4   : > { %p1460_p12 = pnand %p2219_p9, %p2218_p5 }
 0x3a6   : > { %1809 = dma.done.wait (!%p1460_p12), %s1204_s12, 512  }
 0x3a7   : > { %1811 = vsyncadd (!%p1460_p12), %s1204_s12, 4294966784  ;;  %p19_p2 = scmp.ge.s32.totalorder %s1982_s16, 4   ;;  %s2220_s18 = smov %s1818_s19 }
 0x3a8   : > { %s2221_s19 = smov %s1822_s20  ;;  %s2222_s20 = smov %s1991_s27 }
 0x3a9   : > { %s2223_s21 = smov %s1982_s16  ;;  %21 = sbr.rel (!%p19_p2) target bundleno = 6 (0x6), region = 95 }
 0x3b0   :  { %1209 = vsyncpa [#allocation3], 1 }
 0x3b1   :  { %1211 = vsyncpa [#allocation3 + $0x1], 1 }
 0x3b2   :  { %1212 = vsyncpa [#allocation6], 1 }
 0x3b3   :  { %1213 = vsyncpa [#allocation4], 1 }
 0x3b4   :  { %1215 = vsyncpa [#allocation4 + $0x1], 1 }

</bundles_post_ra>
